<compile_context>
chip_gen: v7x
topology: tpu7x:2x2x1
jax: 0.10.0
libtpu: 0.0.40
codegen_flags: <defaults>
</compile_context>

<pallas_src>
import jax
import jax.numpy as jnp
from jax.experimental import pallas as pl
from jax.experimental.pallas import tpu as pltpu

EPS = 1e-5


def _round_up(x: int, m: int) -> int:
    return ((x + m - 1) // m) * m


def _pad2(a, rows: int, cols: int):
    pr, pc = rows - a.shape[0], cols - a.shape[1]
    if pr or pc:
        a = jnp.pad(a, ((0, pr), (0, pc)))
    return a


def _make_kernel(d_in_real: int, h_real: int):
    inv_din = 1.0 / float(d_in_real)
    inv_h = 1.0 / float(h_real)

    def kernel(x_ref, w1_ref, b1_ref, w2_ref, b2_ref, o_ref):
        # ----- Block 1: LayerNorm(D_in) -> Dropout(id) -> Linear -> ReLU -----
        x = x_ref[...].astype(jnp.float32)                       # (tm, D_in_p)
        mu = jnp.sum(x, axis=-1, keepdims=True) * inv_din        # real-D mean
        ex2 = jnp.sum(x * x, axis=-1, keepdims=True) * inv_din
        var = jnp.maximum(ex2 - mu * mu, 0.0)
        xn = (x - mu) * jax.lax.rsqrt(var + EPS)                 # affine folded into w1/b1
        h = jnp.dot(xn.astype(jnp.bfloat16), w1_ref[...],        # bf16 x bf16 -> f32 acc
                    preferred_element_type=jnp.float32) + b1_ref[...]
        h = jnp.maximum(h, 0.0)                                  # ReLU

        # ----- Block 2: LayerNorm(H) -> Dropout(id) -> Linear -----
        mu2 = jnp.sum(h, axis=-1, keepdims=True) * inv_h
        eh2 = jnp.sum(h * h, axis=-1, keepdims=True) * inv_h
        var2 = jnp.maximum(eh2 - mu2 * mu2, 0.0)
        hn = (h - mu2) * jax.lax.rsqrt(var2 + EPS)               # affine folded into w2/b2
        out = jnp.dot(hn.astype(jnp.bfloat16), w2_ref[...],
                      preferred_element_type=jnp.float32) + b2_ref[...]

        o_ref[...] = out.astype(o_ref.dtype)

    return kernel


def projection_mlp(x, params, *, tm=256, vmem_limit_bytes=64 * 1024 * 1024):
    """x: [B, S, D_in] float32. Returns [B, S, D_out] (eval-mode ProjectionMLP)."""
    B, S, D_in = x.shape
    g1, be1, w1, b1, g2, be2, w2, b2 = params
    H = w1.shape[1]
    D_out = w2.shape[1]

    # Lane-dense feature dims (multiples of 128).
    D_in_p = _round_up(D_in, 128)
    H_p = _round_up(H, 128)
    D_out_p = _round_up(D_out, 128)

    # Row tiling: big tile (MXU utilization), clamped for small inputs; pad rows.
    N = B * S
    tm_eff = min(tm, _round_up(N, 8))
    tm_eff = max(8, _round_up(tm_eff, 8))
    N_pad = _round_up(N, tm_eff)

    x2 = _pad2(x.reshape(N, D_in), N_pad, D_in_p)

    # Fold LayerNorm affine into the following Linear (exact in f32):
    #   (x_n * g + b) @ W + c  ==  x_n @ (g[:,None] * W) + (b @ W + c)
    g1f = g1.astype(jnp.float32)
    g2f = g2.astype(jnp.float32)
    w1f = g1f[:, None] * w1.astype(jnp.float32)
    b1f = b1.astype(jnp.float32) + be1.astype(jnp.float32) @ w1.astype(jnp.float32)
    w2f = g2f[:, None] * w2.astype(jnp.float32)
    b2f = b2.astype(jnp.float32) + be2.astype(jnp.float32) @ w2.astype(jnp.float32)

    # Weights as (in, out) = W^T of PyTorch; zero-padded; bf16 for the MXU.
    w1p = _pad2(w1f, D_in_p, H_p).astype(jnp.bfloat16)
    w2p = _pad2(w2f, H_p, D_out_p).astype(jnp.bfloat16)
    b1p = _pad2(b1f.reshape(1, -1), 1, H_p)
    b2p = _pad2(b2f.reshape(1, -1), 1, D_out_p)

    kernel = _make_kernel(D_in, H)

    def run(single_buffer: bool):
        pm = pl.Buffered(1) if single_buffer else None
        # Grid-invariant operands (constant index_map): single-buffer to halve
        # their VMEM footprint (matters for real weight sizes, esp. v7x 64 MiB).
        const = lambda r, c: pl.BlockSpec((r, c), lambda i: (0, 0), pipeline_mode=pm)

        grid_spec = pltpu.PrefetchScalarGridSpec(
            num_scalar_prefetch=0,
            grid=(N_pad // tm_eff,),
            in_specs=[
                pl.BlockSpec((tm_eff, D_in_p), lambda i: (i, 0)),  # x tile
                const(D_in_p, H_p),     # w1 (bf16, LN1 gamma folded in)
                const(1, H_p),          # b1 (LN1 beta folded in)
                const(H_p, D_out_p),    # w2 (bf16, LN2 gamma folded in)
                const(1, D_out_p),      # b2 (LN2 beta folded in)
            ],
            out_specs=pl.BlockSpec((tm_eff, D_out_p), lambda i: (i, 0)),
        )
        return pl.pallas_call(
            kernel,
            out_shape=jax.ShapeDtypeStruct((N_pad, D_out_p), x.dtype),
            grid_spec=grid_spec,
            compiler_params=pltpu.CompilerParams(
                dimension_semantics=("parallel",),   # rows shard across TCs (v7x megacore)
                vmem_limit_bytes=vmem_limit_bytes),
        )(x2, w1p, b1p, w2p, b2p)

    try:
        out = run(True)
    except Exception:
        # Fallback if this runtime rejects pipeline_mode=pl.Buffered(1);
        # identical semantics, just default (double) buffering.
        out = run(False)

    return out[:N, :D_out].reshape(B, S, D_out)


def init_params(key, input_dim, hidden_dim, output_dim):
    """Deterministic init. Linear weights stored as (in_dim, out_dim) = W^T of PyTorch."""
    k1, k2, k3, k4 = jax.random.split(key, 4)
    g1 = jnp.ones((input_dim,), jnp.float32)          # LayerNorm defaults
    be1 = jnp.zeros((input_dim,), jnp.float32)
    lim1 = 1.0 / (input_dim ** 0.5)
    w1 = jax.random.uniform(k1, (input_dim, hidden_dim), jnp.float32, -lim1, lim1)
    b1 = jax.random.uniform(k2, (hidden_dim,), jnp.float32, -lim1, lim1)
    g2 = jnp.ones((hidden_dim,), jnp.float32)
    be2 = jnp.zeros((hidden_dim,), jnp.float32)
    lim2 = 1.0 / (hidden_dim ** 0.5)
    w2 = jax.random.uniform(k3, (hidden_dim, output_dim), jnp.float32, -lim2, lim2)
    b2 = jax.random.uniform(k4, (output_dim,), jnp.float32, -lim2, lim2)
    return (g1, be1, w1, b1, g2, be2, w2, b2)


def reference(x, params):
    """Pure-JAX f32 reference matching PyTorch semantics (eval mode)."""
    g1, be1, w1, b1, g2, be2, w2, b2 = params
    mu = jnp.mean(x, axis=-1, keepdims=True)
    var = jnp.mean((x - mu) ** 2, axis=-1, keepdims=True)
    h = (x - mu) / jnp.sqrt(var + EPS) * g1 + be1
    h = jnp.maximum(h @ w1 + b1, 0.0)
    mu2 = jnp.mean(h, axis=-1, keepdims=True)
    var2 = jnp.mean((h - mu2) ** 2, axis=-1, keepdims=True)
    h2 = (h - mu2) / jnp.sqrt(var2 + EPS) * g2 + be2
    return h2 @ w2 + b2


if __name__ == "__main__":
    input_dim, hidden_dim, output_dim = 32, 64, 32
    B, S = 2, 8

    key = jax.random.PRNGKey(0)
    kx, kp = jax.random.split(key)
    x = jax.random.normal(kx, (B, S, input_dim), jnp.float32)
    params = init_params(kp, input_dim, hidden_dim, output_dim)

    out = projection_mlp(x, params)
    out = jax.block_until_ready(out)

    ref = reference(x, params)
    assert out.shape == (B, S, output_dim)
    # Tolerance loosened because matmul operands are bf16 (f32 accumulation).
    assert jnp.allclose(out, ref, atol=5e-2, rtol=5e-2), "mismatch vs reference"
    print("KERNEL_OK")
</pallas_src>

<mosaic_0001>
module attributes {stable_mosaic.version = 11 : i64} {
  func.func @kernel(%arg0: i32, %arg1: memref<16x128xf32, #tpu.memory_space<vmem>>, %arg2: memref<128x128xbf16, #tpu.memory_space<vmem>>, %arg3: memref<1x128xf32, #tpu.memory_space<vmem>>, %arg4: memref<128x128xbf16, #tpu.memory_space<vmem>>, %arg5: memref<1x128xf32, #tpu.memory_space<vmem>>, %arg6: memref<16x128xf32, #tpu.memory_space<vmem>>) attributes {dimension_semantics = [#tpu.dimension_semantics<parallel>], iteration_bounds = array<i64: 1>, scalar_prefetch = 0 : i64, scratch_operands = 0 : i64, tpu.core_type = #tpu.core_type<tc>, window_params = [{transform_indices = @transform_0, window_bounds = array<i64: 16, 128>}, {pipeline_mode = #tpu.pipeline_mode<synchronous>, transform_indices = @transform_1, window_bounds = array<i64: 128, 128>}, {pipeline_mode = #tpu.pipeline_mode<synchronous>, transform_indices = @transform_2, window_bounds = array<i64: 1, 128>}, {pipeline_mode = #tpu.pipeline_mode<synchronous>, transform_indices = @transform_3, window_bounds = array<i64: 128, 128>}, {pipeline_mode = #tpu.pipeline_mode<synchronous>, transform_indices = @transform_4, window_bounds = array<i64: 1, 128>}, {transform_indices = @transform_5, window_bounds = array<i64: 16, 128>}]} {
    %c0 = arith.constant 0 : index
    %c0_0 = arith.constant 0 : index
    %0 = vector.load %arg1[%c0, %c0_0] : memref<16x128xf32, #tpu.memory_space<vmem>>, vector<16x128xf32>
    %cst = arith.constant dense<0.000000e+00> : vector<16xf32>
    %1 = vector.multi_reduction <add>, %0, %cst [1] : vector<16x128xf32> to vector<16xf32>
    %2 = vector.shape_cast %1 : vector<16xf32> to vector<16x1xf32>
    %cst_1 = arith.constant 3.125000e-02 : f32
    %3 = vector.broadcast %cst_1 : f32 to vector<16x1xf32>
    %4 = arith.mulf %2, %3 : vector<16x1xf32>
    %5 = arith.mulf %0, %0 : vector<16x128xf32>
    %cst_2 = arith.constant dense<0.000000e+00> : vector<16xf32>
    %6 = vector.multi_reduction <add>, %5, %cst_2 [1] : vector<16x128xf32> to vector<16xf32>
    %7 = vector.shape_cast %6 : vector<16xf32> to vector<16x1xf32>
    %cst_3 = arith.constant 3.125000e-02 : f32
    %8 = vector.broadcast %cst_3 : f32 to vector<16x1xf32>
    %9 = arith.mulf %7, %8 : vector<16x1xf32>
    %10 = arith.mulf %4, %4 : vector<16x1xf32>
    %11 = arith.subf %9, %10 : vector<16x1xf32>
    %cst_4 = arith.constant 0.000000e+00 : f32
    %12 = vector.broadcast %cst_4 : f32 to vector<16x1xf32>
    %13 = arith.maximumf %11, %12 : vector<16x1xf32>
    %14 = vector.broadcast %4 : vector<16x1xf32> to vector<16x128xf32>
    %15 = arith.subf %0, %14 : vector<16x128xf32>
    %cst_5 = arith.constant 9.99999974E-6 : f32
    %16 = vector.broadcast %cst_5 : f32 to vector<16x1xf32>
    %17 = arith.addf %13, %16 : vector<16x1xf32>
    %18 = math.rsqrt %17 : vector<16x1xf32>
    %19 = vector.broadcast %18 : vector<16x1xf32> to vector<16x128xf32>
    %20 = arith.mulf %15, %19 : vector<16x128xf32>
    %21 = arith.truncf %20 : vector<16x128xf32> to vector<16x128xbf16>
    %c0_6 = arith.constant 0 : index
    %c0_7 = arith.constant 0 : index
    %22 = vector.load %arg2[%c0_6, %c0_7] : memref<128x128xbf16, #tpu.memory_space<vmem>>, vector<128x128xbf16>
    %cst_8 = arith.constant dense<0.000000e+00> : vector<16x128xf32>
    %23 = tpu.matmul %21, %22, %cst_8 {dimension_numbers = #tpu.dot_dimension_numbers<[1], [0], [0], [1], [0, 0, 1, 1], [], []>} : vector<16x128xbf16>, vector<128x128xbf16>, vector<16x128xf32> -> vector<16x128xf32>
    %c0_9 = arith.constant 0 : index
    %c0_10 = arith.constant 0 : index
    %24 = vector.load %arg3[%c0_9, %c0_10] : memref<1x128xf32, #tpu.memory_space<vmem>>, vector<1x128xf32>
    %25 = vector.broadcast %24 : vector<1x128xf32> to vector<16x128xf32>
    %26 = arith.addf %23, %25 : vector<16x128xf32>
    %cst_11 = arith.constant 0.000000e+00 : f32
    %27 = vector.broadcast %cst_11 : f32 to vector<16x128xf32>
    %28 = arith.maximumf %26, %27 : vector<16x128xf32>
    %cst_12 = arith.constant dense<0.000000e+00> : vector<16xf32>
    %29 = vector.multi_reduction <add>, %28, %cst_12 [1] : vector<16x128xf32> to vector<16xf32>
    %30 = vector.shape_cast %29 : vector<16xf32> to vector<16x1xf32>
    %cst_13 = arith.constant 1.562500e-02 : f32
    %31 = vector.broadcast %cst_13 : f32 to vector<16x1xf32>
    %32 = arith.mulf %30, %31 : vector<16x1xf32>
    %33 = arith.mulf %28, %28 : vector<16x128xf32>
    %cst_14 = arith.constant dense<0.000000e+00> : vector<16xf32>
    %34 = vector.multi_reduction <add>, %33, %cst_14 [1] : vector<16x128xf32> to vector<16xf32>
    %35 = vector.shape_cast %34 : vector<16xf32> to vector<16x1xf32>
    %cst_15 = arith.constant 1.562500e-02 : f32
    %36 = vector.broadcast %cst_15 : f32 to vector<16x1xf32>
    %37 = arith.mulf %35, %36 : vector<16x1xf32>
    %38 = arith.mulf %32, %32 : vector<16x1xf32>
    %39 = arith.subf %37, %38 : vector<16x1xf32>
    %cst_16 = arith.constant 0.000000e+00 : f32
    %40 = vector.broadcast %cst_16 : f32 to vector<16x1xf32>
    %41 = arith.maximumf %39, %40 : vector<16x1xf32>
    %42 = vector.broadcast %32 : vector<16x1xf32> to vector<16x128xf32>
    %43 = arith.subf %28, %42 : vector<16x128xf32>
    %cst_17 = arith.constant 9.99999974E-6 : f32
    %44 = vector.broadcast %cst_17 : f32 to vector<16x1xf32>
    %45 = arith.addf %41, %44 : vector<16x1xf32>
    %46 = math.rsqrt %45 : vector<16x1xf32>
    %47 = vector.broadcast %46 : vector<16x1xf32> to vector<16x128xf32>
    %48 = arith.mulf %43, %47 : vector<16x128xf32>
    %49 = arith.truncf %48 : vector<16x128xf32> to vector<16x128xbf16>
    %c0_18 = arith.constant 0 : index
    %c0_19 = arith.constant 0 : index
    %50 = vector.load %arg4[%c0_18, %c0_19] : memref<128x128xbf16, #tpu.memory_space<vmem>>, vector<128x128xbf16>
    %cst_20 = arith.constant dense<0.000000e+00> : vector<16x128xf32>
    %51 = tpu.matmul %49, %50, %cst_20 {dimension_numbers = #tpu.dot_dimension_numbers<[1], [0], [0], [1], [0, 0, 1, 1], [], []>} : vector<16x128xbf16>, vector<128x128xbf16>, vector<16x128xf32> -> vector<16x128xf32>
    %c0_21 = arith.constant 0 : index
    %c0_22 = arith.constant 0 : index
    %52 = vector.load %arg5[%c0_21, %c0_22] : memref<1x128xf32, #tpu.memory_space<vmem>>, vector<1x128xf32>
    %53 = vector.broadcast %52 : vector<1x128xf32> to vector<16x128xf32>
    %54 = arith.addf %51, %53 : vector<16x128xf32>
    %c0_23 = arith.constant 0 : index
    %c0_24 = arith.constant 0 : index
    %55 = vector.load %arg6[%c0_23, %c0_24] : memref<16x128xf32, #tpu.memory_space<vmem>>, vector<16x128xf32>
    tpu.vector_store %arg6[%c0_23, %c0_24], %54 {strides = array<i32>} : memref<16x128xf32, #tpu.memory_space<vmem>>, vector<16x128xf32>,
    return
  }
  func.func @transform_0(%arg0: i32) -> (i32, i32) {
    %c0_i32 = arith.constant 0 : i32
    %c0_i32_0 = arith.constant 0 : i32
    return %arg0, %c0_i32 : i32, i32
  }
  func.func @transform_1(%arg0: i32) -> (i32, i32) {
    %c0_i32 = arith.constant 0 : i32
    %c0_i32_0 = arith.constant 0 : i32
    %c0_i32_1 = arith.constant 0 : i32
    return %c0_i32, %c0_i32_0 : i32, i32
  }
  func.func @transform_2(%arg0: i32) -> (i32, i32) {
    %c0_i32 = arith.constant 0 : i32
    %c0_i32_0 = arith.constant 0 : i32
    %c0_i32_1 = arith.constant 0 : i32
    return %c0_i32, %c0_i32_0 : i32, i32
  }
  func.func @transform_3(%arg0: i32) -> (i32, i32) {
    %c0_i32 = arith.constant 0 : i32
    %c0_i32_0 = arith.constant 0 : i32
    %c0_i32_1 = arith.constant 0 : i32
    return %c0_i32, %c0_i32_0 : i32, i32
  }
  func.func @transform_4(%arg0: i32) -> (i32, i32) {
    %c0_i32 = arith.constant 0 : i32
    %c0_i32_0 = arith.constant 0 : i32
    %c0_i32_1 = arith.constant 0 : i32
    return %c0_i32, %c0_i32_0 : i32, i32
  }
  func.func @transform_5(%arg0: i32) -> (i32, i32) {
    %c0_i32 = arith.constant 0 : i32
    %c0_i32_0 = arith.constant 0 : i32
    return %arg0, %c0_i32 : i32, i32
  }
}

module attributes {stable_mosaic.version = 11 : i64} {
  func.func @kernel(%arg0: i32, %arg1: memref<16x128xf32, #tpu.memory_space<vmem>>, %arg2: memref<128x128xbf16, #tpu.memory_space<vmem>>, %arg3: memref<1x128xf32, #tpu.memory_space<vmem>>, %arg4: memref<128x128xbf16, #tpu.memory_space<vmem>>, %arg5: memref<1x128xf32, #tpu.memory_space<vmem>>, %arg6: memref<16x128xf32, #tpu.memory_space<vmem>>) attributes {dimension_semantics = [#tpu.dimension_semantics<parallel>], iteration_bounds = array<i64: 1>, scalar_prefetch = 0 : i64, scratch_operands = 0 : i64, tpu.core_type = #tpu.core_type<tc>, window_params = [{transform_indices = @transform_0, window_bounds = array<i64: 16, 128>}, {pipeline_mode = #tpu.pipeline_mode<synchronous>, transform_indices = @transform_1, window_bounds = array<i64: 128, 128>}, {pipeline_mode = #tpu.pipeline_mode<synchronous>, transform_indices = @transform_2, window_bounds = array<i64: 1, 128>}, {pipeline_mode = #tpu.pipeline_mode<synchronous>, transform_indices = @transform_3, window_bounds = array<i64: 128, 128>}, {pipeline_mode = #tpu.pipeline_mode<synchronous>, transform_indices = @transform_4, window_bounds = array<i64: 1, 128>}, {transform_indices = @transform_5, window_bounds = array<i64: 16, 128>}]} {
    %c0 = arith.constant 0 : index
    %c0_0 = arith.constant 0 : index
    %0 = vector.load %arg1[%c0, %c0_0] : memref<16x128xf32, #tpu.memory_space<vmem>>, vector<16x128xf32>
    %cst = arith.constant dense<0.000000e+00> : vector<16xf32>
    %1 = vector.multi_reduction <add>, %0, %cst [1] : vector<16x128xf32> to vector<16xf32>
    %2 = vector.shape_cast %1 : vector<16xf32> to vector<16x1xf32>
    %cst_1 = arith.constant 3.125000e-02 : f32
    %3 = vector.broadcast %cst_1 : f32 to vector<16x1xf32>
    %4 = arith.mulf %2, %3 : vector<16x1xf32>
    %5 = arith.mulf %0, %0 : vector<16x128xf32>
    %cst_2 = arith.constant dense<0.000000e+00> : vector<16xf32>
    %6 = vector.multi_reduction <add>, %5, %cst_2 [1] : vector<16x128xf32> to vector<16xf32>
    %7 = vector.shape_cast %6 : vector<16xf32> to vector<16x1xf32>
    %cst_3 = arith.constant 3.125000e-02 : f32
    %8 = vector.broadcast %cst_3 : f32 to vector<16x1xf32>
    %9 = arith.mulf %7, %8 : vector<16x1xf32>
    %10 = arith.mulf %4, %4 : vector<16x1xf32>
    %11 = arith.subf %9, %10 : vector<16x1xf32>
    %cst_4 = arith.constant 0.000000e+00 : f32
    %12 = vector.broadcast %cst_4 : f32 to vector<16x1xf32>
    %13 = arith.maximumf %11, %12 : vector<16x1xf32>
    %14 = vector.broadcast %4 : vector<16x1xf32> to vector<16x128xf32>
    %15 = arith.subf %0, %14 : vector<16x128xf32>
    %cst_5 = arith.constant 9.99999974E-6 : f32
    %16 = vector.broadcast %cst_5 : f32 to vector<16x1xf32>
    %17 = arith.addf %13, %16 : vector<16x1xf32>
    %18 = math.rsqrt %17 : vector<16x1xf32>
    %19 = vector.broadcast %18 : vector<16x1xf32> to vector<16x128xf32>
    %20 = arith.mulf %15, %19 : vector<16x128xf32>
    %21 = arith.truncf %20 : vector<16x128xf32> to vector<16x128xbf16>
    %c0_6 = arith.constant 0 : index
    %c0_7 = arith.constant 0 : index
    %22 = vector.load %arg2[%c0_6, %c0_7] : memref<128x128xbf16, #tpu.memory_space<vmem>>, vector<128x128xbf16>
    %cst_8 = arith.constant dense<0.000000e+00> : vector<16x128xf32>
    %23 = tpu.matmul %21, %22, %cst_8 {dimension_numbers = #tpu.dot_dimension_numbers<[1], [0], [0], [1], [0, 0, 1, 1], [], []>} : vector<16x128xbf16>, vector<128x128xbf16>, vector<16x128xf32> -> vector<16x128xf32>
    %c0_9 = arith.constant 0 : index
    %c0_10 = arith.constant 0 : index
    %24 = vector.load %arg3[%c0_9, %c0_10] : memref<1x128xf32, #tpu.memory_space<vmem>>, vector<1x128xf32>
    %25 = vector.broadcast %24 : vector<1x128xf32> to vector<16x128xf32>
    %26 = arith.addf %23, %25 : vector<16x128xf32>
    %cst_11 = arith.constant 0.000000e+00 : f32
    %27 = vector.broadcast %cst_11 : f32 to vector<16x128xf32>
    %28 = arith.maximumf %26, %27 : vector<16x128xf32>
    %cst_12 = arith.constant dense<0.000000e+00> : vector<16xf32>
    %29 = vector.multi_reduction <add>, %28, %cst_12 [1] : vector<16x128xf32> to vector<16xf32>
    %30 = vector.shape_cast %29 : vector<16xf32> to vector<16x1xf32>
    %cst_13 = arith.constant 1.562500e-02 : f32
    %31 = vector.broadcast %cst_13 : f32 to vector<16x1xf32>
    %32 = arith.mulf %30, %31 : vector<16x1xf32>
    %33 = arith.mulf %28, %28 : vector<16x128xf32>
    %cst_14 = arith.constant dense<0.000000e+00> : vector<16xf32>
    %34 = vector.multi_reduction <add>, %33, %cst_14 [1] : vector<16x128xf32> to vector<16xf32>
    %35 = vector.shape_cast %34 : vector<16xf32> to vector<16x1xf32>
    %cst_15 = arith.constant 1.562500e-02 : f32
    %36 = vector.broadcast %cst_15 : f32 to vector<16x1xf32>
    %37 = arith.mulf %35, %36 : vector<16x1xf32>
    %38 = arith.mulf %32, %32 : vector<16x1xf32>
    %39 = arith.subf %37, %38 : vector<16x1xf32>
    %cst_16 = arith.constant 0.000000e+00 : f32
    %40 = vector.broadcast %cst_16 : f32 to vector<16x1xf32>
    %41 = arith.maximumf %39, %40 : vector<16x1xf32>
    %42 = vector.broadcast %32 : vector<16x1xf32> to vector<16x128xf32>
    %43 = arith.subf %28, %42 : vector<16x128xf32>
    %cst_17 = arith.constant 9.99999974E-6 : f32
    %44 = vector.broadcast %cst_17 : f32 to vector<16x1xf32>
    %45 = arith.addf %41, %44 : vector<16x1xf32>
    %46 = math.rsqrt %45 : vector<16x1xf32>
    %47 = vector.broadcast %46 : vector<16x1xf32> to vector<16x128xf32>
    %48 = arith.mulf %43, %47 : vector<16x128xf32>
    %49 = arith.truncf %48 : vector<16x128xf32> to vector<16x128xbf16>
    %c0_18 = arith.constant 0 : index
    %c0_19 = arith.constant 0 : index
    %50 = vector.load %arg4[%c0_18, %c0_19] : memref<128x128xbf16, #tpu.memory_space<vmem>>, vector<128x128xbf16>
    %cst_20 = arith.constant dense<0.000000e+00> : vector<16x128xf32>
    %51 = tpu.matmul %49, %50, %cst_20 {dimension_numbers = #tpu.dot_dimension_numbers<[1], [0], [0], [1], [0, 0, 1, 1], [], []>} : vector<16x128xbf16>, vector<128x128xbf16>, vector<16x128xf32> -> vector<16x128xf32>
    %c0_21 = arith.constant 0 : index
    %c0_22 = arith.constant 0 : index
    %52 = vector.load %arg5[%c0_21, %c0_22] : memref<1x128xf32, #tpu.memory_space<vmem>>, vector<1x128xf32>
    %53 = vector.broadcast %52 : vector<1x128xf32> to vector<16x128xf32>
    %54 = arith.addf %51, %53 : vector<16x128xf32>
    %c0_23 = arith.constant 0 : index
    %c0_24 = arith.constant 0 : index
    %55 = vector.load %arg6[%c0_23, %c0_24] : memref<16x128xf32, #tpu.memory_space<vmem>>, vector<16x128xf32>
    tpu.vector_store %arg6[%c0_23, %c0_24], %54 {strides = array<i32>} : memref<16x128xf32, #tpu.memory_space<vmem>>, vector<16x128xf32>,
    return
  }
  func.func @transform_0(%arg0: i32) -> (i32, i32) {
    %c0_i32 = arith.constant 0 : i32
    %c0_i32_0 = arith.constant 0 : i32
    return %arg0, %c0_i32 : i32, i32
  }
  func.func @transform_1(%arg0: i32) -> (i32, i32) {
    %c0_i32 = arith.constant 0 : i32
    %c0_i32_0 = arith.constant 0 : i32
    %c0_i32_1 = arith.constant 0 : i32
    return %c0_i32, %c0_i32_0 : i32, i32
  }
  func.func @transform_2(%arg0: i32) -> (i32, i32) {
    %c0_i32 = arith.constant 0 : i32
    %c0_i32_0 = arith.constant 0 : i32
    %c0_i32_1 = arith.constant 0 : i32
    return %c0_i32, %c0_i32_0 : i32, i32
  }
  func.func @transform_3(%arg0: i32) -> (i32, i32) {
    %c0_i32 = arith.constant 0 : i32
    %c0_i32_0 = arith.constant 0 : i32
    %c0_i32_1 = arith.constant 0 : i32
    return %c0_i32, %c0_i32_0 : i32, i32
  }
  func.func @transform_4(%arg0: i32) -> (i32, i32) {
    %c0_i32 = arith.constant 0 : i32
    %c0_i32_0 = arith.constant 0 : i32
    %c0_i32_1 = arith.constant 0 : i32
    return %c0_i32, %c0_i32_0 : i32, i32
  }
  func.func @transform_5(%arg0: i32) -> (i32, i32) {
    %c0_i32 = arith.constant 0 : i32
    %c0_i32_0 = arith.constant 0 : i32
    return %arg0, %c0_i32 : i32, i32
  }
}

</mosaic_0001>

<bundles_post_ra>
// kernel: tpu_custom_call.1
= control target key start
LH: loop header
LB: loop body
LE: loop exit
PB: predicated region body
PF: predicated region fallthrough
CT: control target
= control target key end

     0   :  { %10 = vsyncpa [#allocation3], 0  ;;  %s783_s0 = inlined_call_operand.hbm [shape: f32[16,128], index: 0, kind: input, shape index: {}]   ;;  %s784_s1 = inlined_call_operand.hbm [shape: bf16[128,128], index: 1, kind: input, shape index: {}]   ;;  %s785_s2 = inlined_call_operand.hbm [shape: f32[1,128], index: 2, kind: input, shape index: {}]   ;;  %s786_s3 = inlined_call_operand.hbm [shape: bf16[128,128], index: 3, kind: input, shape index: {}]   ;;  %s787_s4 = inlined_call_operand.hbm [shape: f32[1,128], index: 4, kind: input, shape index: {}]   ;;  %s788_s5 = inlined_call_operand.hbm [shape: f32[16,128], index: 5, kind: output, shape index: {}]  }
   0x1   :  { %11 = vsyncpa [#allocation6], 0 }
   0x2   :  { %12 = vsyncpa [#allocation9], 0 }
   0x3   :  { %13 = vsyncpa [#allocation4], 0  ;;  %s645_s18 = smov [#allocation5]   ;;  %s505_s22 = scalar_lea.hbm %s784_s1, 1024 }
   0x4   :  { %s31_s19 = sshll.u32 %s645_s18, 4  ;;  %p506_p0 = scmp.ne.s32.totalorder %s784_s1, %s505_s22  ;;  %s32_s19 = int_to_ptr.vmem [resolvable:$true] %s31_s19 }
   0x5   :  { %p509_p1 = scmp.lt.u32.totalorder %s505_s22, %s784_s1 }
   0x7   :  { %p511_p2 = pnand %p509_p1, %p506_p0 }
   0x9   :  { %514 = shalt.err (!%p511_p2)
}
   0xa   :  { %s515_s27 = scalar_lea.vmem %s32_s19, 1024  ;;  %p520_p4 = scmp.lt.s32.totalorder %s32_s19, %s32_s19 }
   0xb   :  { %p516_p3 = scmp.ne.s32.totalorder %s32_s19, %s515_s27  ;;  %p521_p5 = scmp.lt.s32.totalorder %s515_s27, %s515_s27 }
   0xd   :  { %p522_p6 = por %p521_p5, %p520_p4 }
   0xf   :  { %p523_p7 = pnand %p522_p6, %p516_p3 }
  0x11   :  { %526 = shalt.err (!%p523_p7)
}
  0x12   :  { %s646_s28 = smov 64   ;;  %s647_s29 = smov 4  }
  0x13   :  { %37 = dma.hbm_to_vmem [thread:$0]  %s784_s1, 1024, %s32_s19, [#allocation6], %s646_s28, %s646_s28, %s647_s29  }
  0x14   :  { %s648_s7 = smov [#allocation8]   ;;  %s649_s9 = smov [#allocation2]  }
  0x15   :  { %s53_s8 = sshll.u32 %s648_s7, 4  ;;  %s19_s10 = sshll.u32 %s649_s9, 4  ;;  %s54_s8 = int_to_ptr.vmem [resolvable:$true] %s53_s8  ;;  %s20_s10 = int_to_ptr.vmem [resolvable:$true] %s19_s10 }
  0x16   :  { %s527_s13 = scalar_lea.hbm %s786_s3, 1024 }
  0x17   :  { %p528_p8 = scmp.ne.s32.totalorder %s786_s3, %s527_s13  ;;  %p531_p9 = scmp.lt.u32.totalorder %s527_s13, %s786_s3 }
  0x19   :  { %p533_p10 = pnand %p531_p9, %p528_p8 }
  0x1b   :  { %536 = shalt.err (!%p533_p10)
}
  0x1c   :  { %s537_s1 = scalar_lea.vmem %s54_s8, 1024  ;;  %p542_p12 = scmp.lt.s32.totalorder %s54_s8, %s54_s8 }
  0x1d   :  { %p538_p11 = scmp.ne.s32.totalorder %s54_s8, %s537_s1  ;;  %p543_p13 = scmp.lt.s32.totalorder %s537_s1, %s537_s1 }
  0x1f   :  { %p544_p0 = por %p543_p13, %p542_p12 }
  0x21   :  { %p545_p1 = pnand %p544_p0, %p538_p11 }
  0x23   :  { %548 = shalt.err (!%p545_p1)
}
  0x24   :  { %59 = dma.hbm_to_vmem [thread:$0]  %s786_s3, 1024, %s54_s8, [#allocation9], %s646_s28, %s646_s28, %s647_s29  }
  0x25   :  { %s549_s22 = scalar_lea.hbm %s783_s0, 256 }
  0x26   :  { %p550_p2 = scmp.ne.s32.totalorder %s783_s0, %s549_s22  ;;  %p553_p3 = scmp.lt.u32.totalorder %s549_s22, %s783_s0 }
  0x28   :  { %p555_p4 = pnand %p553_p3, %p550_p2 }
  0x2a   :  { %558 = shalt.err (!%p555_p4)
}
  0x2b   :  { %s559_s27 = scalar_lea.vmem %s20_s10, 256  ;;  %p564_p6 = scmp.lt.s32.totalorder %s20_s10, %s20_s10 }
  0x2c   :  { %p560_p5 = scmp.ne.s32.totalorder %s20_s10, %s559_s27  ;;  %p565_p7 = scmp.lt.s32.totalorder %s559_s27, %s559_s27 }
  0x2e   :  { %p566_p8 = por %p565_p7, %p564_p6 }
  0x30   :  { %p567_p9 = pnand %p566_p8, %p560_p5 }
  0x32   :  { %570 = shalt.err (!%p567_p9)
}
  0x33   :  { %s650_s3 = smov 128   ;;  %s651_s28 = smov 8  }
  0x34   :  { %25 = dma.hbm_to_vmem [thread:$0]  %s783_s0, 256, %s20_s10, [#allocation3], %s650_s3, %s650_s3, %s651_s28  }
  0x35   :  { %s652_s6 = smov [#allocation7]   ;;  %s653_s8 = smov [#allocation10]  }
  0x36   :  { %s44_s7 = sshll.u32 %s652_s6, 4  ;;  %s66_s9 = sshll.u32 %s653_s8, 4  ;;  %s45_s7 = int_to_ptr.vmem [resolvable:$true] %s44_s7  ;;  %s67_s9 = int_to_ptr.vmem [resolvable:$true] %s66_s9 }
  0x37   :  { %s571_s13 = scalar_lea.hbm %s785_s2, 16 }
  0x38   :  { %p572_p10 = scmp.ne.s32.totalorder %s785_s2, %s571_s13  ;;  %p575_p11 = scmp.lt.u32.totalorder %s571_s13, %s785_s2 }
  0x3a   :  { %p577_p12 = pnand %p575_p11, %p572_p10 }
  0x3c   :  { %580 = shalt.err (!%p577_p12)
}
  0x3d   :  { %s581_s0 = scalar_lea.vmem %s45_s7, 16  ;;  %s585_s10 = scalar_lea.vmem %s45_s7, 32 }
  0x3e   :  { %p582_p13 = scmp.ne.s32.totalorder %s45_s7, %s581_s0  ;;  %p586_p0 = scmp.lt.s32.totalorder %s45_s7, %s45_s7 }
  0x3f   :  { %p587_p1 = scmp.lt.s32.totalorder %s585_s10, %s581_s0 }
  0x41   :  { %p588_p2 = por %p587_p1, %p586_p0 }
  0x43   :  { %p589_p3 = pnand %p588_p2, %p582_p13 }
  0x45   :  { %592 = shalt.err (!%p589_p3)
}
  0x46   :  { %47 = dma.hbm_to_vmem [thread:$0]  %s785_s2, 16, %s45_s7, [#allocation6]  }
  0x47   :  { %s593_s21 = scalar_lea.hbm %s787_s4, 16 }
  0x48   :  { %p594_p4 = scmp.ne.s32.totalorder %s787_s4, %s593_s21  ;;  %p597_p5 = scmp.lt.u32.totalorder %s593_s21, %s787_s4 }
  0x4a   :  { %p599_p6 = pnand %p597_p5, %p594_p4 }
  0x4c   :  { %602 = shalt.err (!%p599_p6)
}
  0x4d   :  { %s603_s26 = scalar_lea.vmem %s67_s9, 16  ;;  %s607_s27 = scalar_lea.vmem %s67_s9, 32 }
  0x4e   :  { %p604_p7 = scmp.ne.s32.totalorder %s67_s9, %s603_s26  ;;  %p608_p8 = scmp.lt.s32.totalorder %s67_s9, %s67_s9 }
  0x4f   :  { %p609_p9 = scmp.lt.s32.totalorder %s607_s27, %s603_s26 }
  0x51   :  { %p610_p10 = por %p609_p9, %p608_p8 }
  0x53   :  { %p611_p11 = pnand %p610_p10, %p604_p7 }
  0x55   :  { %614 = shalt.err (!%p611_p11)
}
  0x56   :  { %69 = dma.hbm_to_vmem [thread:$0]  %s787_s4, 16, %s67_s9, [#allocation9]  }
  0x57   :  { %637 = dma.done.wait [#allocation3], 256  }
  0x58   :  { %638 = vsyncadd [#allocation3], 4294967040 }
  0x59   :  { %639 = dma.done.wait [#allocation6], 1040  }
  0x5a   :  { %640 = vsyncadd [#allocation6], 4294966256 }
  0x5b   :  { %641 = dma.done.wait [#allocation9], 1040  }
  0x5c   :  { %642 = vsyncadd [#allocation9], 4294966256  ;;  %v654_v0 = vmov 0.0   ;;  %v86_v1 = vld [vmem:[#allocation2] sm:$0xff]  ;;  %v87_v2 = vld [vmem:[#allocation2 + $0x8] sm:$0xff]  ;;  %vm655_vm0 = vmmov 0  }
  0x5d   :  { %429 = vmatprep.subr.bf16.mxu0 %v654_v0  ;;  %449 = vmatprep.subr.bf16.mxu1 %v654_v0  ;;  %v94_v3 = vmul.f32 %v86_v1, %v86_v1  ;;  %v481_v4 = vld [vmem:[#allocation5] sm:$0xff]   ;;  %v95_v5 = vmul.f32 %v87_v2, %v87_v2  ;;  %v482_v6 = vld [vmem:[#allocation5 + $0x8] sm:$0xff]   ;;  %v483_v7 = vld [vmem:[#allocation5 + $0x10] sm:$0xff]   ;;  %s656_s4 = smov [#allocation11]  }
  0x5e   :  { %88 = vadd.xlane.f32.xlu0 %v86_v1  ;;  %430 = vmatpush3.bf16.msra.mxu0 %v481_v4  ;;  %v484_v8 = vld [vmem:[#allocation5 + $0x18] sm:$0xff]   ;;  %v485_v9 = vld [vmem:[#allocation5 + $0x20] sm:$0xff]   ;;  %v486_v10 = vld [vmem:[#allocation5 + $0x28] sm:$0xff]   ;;  %s379_s30 = sshll.u32 %s656_s4, 4  ;;  %s380_s30 = int_to_ptr.vmem [resolvable:$true] %s379_s30 }
  0x5f   :  { %96 = vadd.xlane.f32.xlu1 %v94_v3  ;;  %431 = vmatprep.subr.bf16.mxu0 %v654_v0  ;;  %v487_v11 = vld [vmem:[#allocation5 + $0x30] sm:$0xff]   ;;  %v488_v12 = vld [vmem:[#allocation5 + $0x38] sm:$0xff]   ;;  %v489_v36 = vld [vmem:[#allocation8] sm:$0xff]   ;;  %s615_s6 = scalar_lea.vmem %s380_s30, 256  ;;  %p620_p13 = scmp.lt.s32.totalorder %s380_s30, %s380_s30 }
  0x60   :  { %445 = vmatprep.mubr.msk.bf16.mxu0 %vm655_vm0, %v654_v0  ;;  %465 = vmatprep.mubr.msk.bf16.mxu1 %vm655_vm0, %v654_v0  ;;  %v393_v37 = vld [vmem:[#allocation7] ss:$0 sm:$0xff]  ;;  %v490_v48 = vld [vmem:[#allocation8 + $0x8] sm:$0xff]   ;;  %v491_v49 = vld [vmem:[#allocation8 + $0x10] sm:$0xff]   ;;  %p616_p12 = scmp.ne.s32.totalorder %s380_s30, %s615_s6  ;;  %p621_p0 = scmp.lt.s32.totalorder %s615_s6, %s615_s6 }
  0x61   :  { %450 = vmatpush3.bf16.msra.mxu1 %v489_v36  ;;  %v492_v50 = vld [vmem:[#allocation8 + $0x18] sm:$0xff]   ;;  %v493_v51 = vld [vmem:[#allocation8 + $0x20] sm:$0xff]   ;;  %v494_v52 = vld [vmem:[#allocation8 + $0x28] sm:$0xff]  }
  0x62   :  { %90 = vadd.xlane.f32.xlu0 %v87_v2  ;;  %432 = vmatpush3.bf16.msra.mxu0 %v482_v6  ;;  %v495_v53 = vld [vmem:[#allocation8 + $0x30] sm:$0xff]   ;;  %v496_v54 = vld [vmem:[#allocation8 + $0x38] sm:$0xff]   ;;  %p622_p1 = por %p621_p0, %p620_p13 }
  0x63   :  { %98 = vadd.xlane.f32.xlu1 %v95_v5  ;;  %433 = vmatprep.subr.bf16.mxu0 %v654_v0 }
  0x64   :  { %451 = vmatprep.subr.bf16.mxu1 %v654_v0  ;;  %p623_p2 = pnand %p622_p1, %p616_p12 }
  0x65   :  { %452 = vmatpush3.bf16.msra.mxu1 %v490_v48 }
  0x66   :  { %434 = vmatpush3.bf16.msra.mxu0 %v483_v7  ;;  %453 = vmatprep.subr.bf16.mxu1 %v654_v0 }
  0x67   :  { %435 = vmatprep.subr.bf16.mxu0 %v654_v0 }
  0x69   :  { %454 = vmatpush3.bf16.msra.mxu1 %v491_v49 }
  0x6a   :  { %436 = vmatpush3.bf16.msra.mxu0 %v484_v8  ;;  %455 = vmatprep.subr.bf16.mxu1 %v654_v0 }
  0x6b   :  { %437 = vmatprep.subr.bf16.mxu0 %v654_v0 }
  0x6d   :  { %456 = vmatpush3.bf16.msra.mxu1 %v492_v50 }
  0x6e   :  { %438 = vmatpush3.bf16.msra.mxu0 %v485_v9  ;;  %457 = vmatprep.subr.bf16.mxu1 %v654_v0 }
  0x6f   :  { %439 = vmatprep.subr.bf16.mxu0 %v654_v0 }
  0x71   :  { %458 = vmatpush3.bf16.msra.mxu1 %v493_v51 }
  0x72   :  { %440 = vmatpush3.bf16.msra.mxu0 %v486_v10  ;;  %459 = vmatprep.subr.bf16.mxu1 %v654_v0 }
  0x73   :  { %441 = vmatprep.subr.bf16.mxu0 %v654_v0 }
  0x75   :  { %460 = vmatpush3.bf16.msra.mxu1 %v494_v52 }
  0x76   :  { %442 = vmatpush3.bf16.msra.mxu0 %v487_v11  ;;  %461 = vmatprep.subr.bf16.mxu1 %v654_v0 }
  0x77   :  { %443 = vmatprep.subr.bf16.mxu0 %v654_v0 }
  0x79   :  { %462 = vmatpush3.bf16.msra.mxu1 %v495_v53 }
  0x7a   :  { %444 = vmatpush3.bf16.msra.mxu0 %v488_v12  ;;  %463 = vmatprep.subr.bf16.mxu1 %v654_v0 }
  0x7d   :  { %464 = vmatpush3.bf16.msra.mxu1 %v496_v54 }
  0xeb   :  { %v89_v13 = vpop.xlane.xlu0 %88 }
  0xec   :  { %v92_v14 = vmul.f32 0.03125, %v89_v13  ;;  %v97_v15 = vpop.xlane.xlu1 %96 }
  0xed   :  { %v100_v17 = vmul.f32 0.03125, %v97_v15 }
  0xee   :  { %v102_v16 = vmul.f32 %v92_v14, %v92_v14  ;;  %v108_v30 = vsub.f32 %v86_v1, %v92_v14  ;;  %v402_v14 = vld [vmem:[#allocation10] ss:$0 sm:$0xff] }
  0xef   :  { %v91_v18 = vpop.xlane.xlu0 %90 }
  0xf0   :  { %v104_v19 = vsub.f32 %v100_v17, %v102_v16  ;;  %v93_v20 = vmul.f32 0.03125, %v91_v18  ;;  %v99_v21 = vpop.xlane.xlu1 %98 }
  0xf1   :  { %v101_v24 = vmul.f32 0.03125, %v99_v21 }
  0xf2   :  { %v106_v22 = vmax.f32 %v104_v19, 0.0  ;;  %v103_v23 = vmul.f32 %v93_v20, %v93_v20  ;;  %v109_v31 = vsub.f32 %v87_v2, %v93_v20 }
  0xf4   :  { %v110_v25 = vadd.f32 1e-05, %v106_v22  ;;  %v105_v26 = vsub.f32 %v101_v24, %v103_v23 }
  0xf6   :  { %v107_v27 = vmax.f32 %v105_v26, 0.0  ;;  %497 = vrsqrt.f32 %v110_v25 }
  0xf8   :  { %v111_v28 = vadd.f32 1e-05, %v107_v27 }
  0xfa   :  { %499 = vrsqrt.f32 %v111_v28 }
 0x100   :  { %v498_v29 = vpop.eup %497 }
 0x101   :  { %v114_v33 = vmul.f32 %v498_v29, %v108_v30 }
 0x104   :  { %v500_v32 = vpop.eup %499 }
 0x105   :  { %v115_v34 = vmul.f32 %v500_v32, %v109_v31 }
 0x107   :  { %v116_v35 = vpack.c.bf16 %v115_v34, %v114_v33 }
 0x109   :  { %446 = vmatmul.mubr.bf16.vlgmr.msra.gmra.mrb[0].mxu0 %v116_v35 }
 0x1dc   :  { %v222_v38 = vpop.f32.mrb[0].mxu0 }
 0x1dd   :  { %v223_v39 = vadd.f32 %v393_v37, %v222_v38  ;;  %v447_v40 = vpop.f32.mrb[1].mxu0 }
 0x1de   :  { %v225_v41 = vpop.f32.mrb[2].mxu0 }
 0x1df   :  { %v229_v42 = vmax.f32 %v223_v39, 0.0  ;;  %v226_v43 = vadd.f32 %v393_v37, %v225_v41  ;;  %v448_v44 = vpop.f32.mrb[3].mxu0 }
 0x1e1   :  { %v230_v45 = vmax.f32 %v226_v43, 0.0  ;;  %231 = vadd.xlane.f32.xlu0 %v229_v42  ;;  %v237_v46 = vmul.f32 %v229_v42, %v229_v42 }
 0x1e3   :  { %233 = vadd.xlane.f32.xlu1 %v230_v45  ;;  %v238_v47 = vmul.f32 %v230_v45, %v230_v45 }
 0x1e5   :  { %239 = vadd.xlane.f32.xlu0 %v237_v46 }
 0x1e7   :  { %241 = vadd.xlane.f32.xlu1 %v238_v47 }
 0x26e   :  { %v232_v55 = vpop.xlane.xlu0 %231 }
 0x26f   :  { %v235_v56 = vmul.f32 0.015625, %v232_v55 }
 0x270   :  { %v234_v57 = vpop.xlane.xlu1 %233 }
 0x271   :  { %v236_v58 = vmul.f32 0.015625, %v234_v57  ;;  %v245_v60 = vmul.f32 %v235_v56, %v235_v56  ;;  %v251_v8 = vsub.f32 %v229_v42, %v235_v56 }
 0x272   :  { %v240_v59 = vpop.xlane.xlu0 %239 }
 0x273   :  { %v243_v61 = vmul.f32 0.015625, %v240_v59  ;;  %v246_v63 = vmul.f32 %v236_v58, %v236_v58  ;;  %v252_v9 = vsub.f32 %v230_v45, %v236_v58 }
 0x274   :  { %v242_v62 = vpop.xlane.xlu1 %241 }
 0x275   :  { %v247_v1 = vsub.f32 %v243_v61, %v245_v60  ;;  %v244_v2 = vmul.f32 0.015625, %v242_v62 }
 0x277   :  { %v249_v3 = vmax.f32 %v247_v1, 0.0  ;;  %v248_v4 = vsub.f32 %v244_v2, %v246_v63 }
 0x279   :  { %v253_v5 = vadd.f32 1e-05, %v249_v3  ;;  %v250_v6 = vmax.f32 %v248_v4, 0.0 }
 0x27b   :  { %501 = vrsqrt.f32 %v253_v5  ;;  %v254_v7 = vadd.f32 1e-05, %v250_v6 }
 0x27d   :  { %503 = vrsqrt.f32 %v254_v7 }
 0x285   :  { %v502_v0 = vpop.eup %501 }
 0x286   :  { %v257_v11 = vmul.f32 %v502_v0, %v251_v8 }
 0x287   :  { %v504_v10 = vpop.eup %503 }
 0x288   :  { %v258_v12 = vmul.f32 %v504_v10, %v252_v9 }
 0x28a   :  { %v259_v13 = vpack.c.bf16 %v258_v12, %v257_v11 }
 0x28c   :  { %466 = vmatmul.mubr.bf16.vlgmr.msra.gmra.mrb[0].mxu1 %v259_v13 }
 0x35f   :  { %v365_v15 = vpop.f32.mrb[0].mxu1 }
 0x360   :  { %v366_v16 = vadd.f32 %v402_v14, %v365_v15  ;;  %v467_v17 = vpop.f32.mrb[1].mxu1 }
 0x361   :  { %v368_v18 = vpop.f32.mrb[2].mxu1 }
 0x362   :  { %372 = vst [vmem:[#allocation11] sm:$0xff] %v366_v16  ;;  %v369_v19 = vadd.f32 %v402_v14, %v368_v18  ;;  %v468_v20 = vpop.f32.mrb[3].mxu1 }
 0x364   :  { %373 = vst [vmem:[#allocation11 + $0x8] sm:$0xff] %v369_v19 }
 0x365   :  { %626 = shalt.err (!%p623_p2)
}
 0x366   :  { %s627_s9 = scalar_lea.hbm %s788_s5, 256 }
 0x367   :  { %p628_p3 = scmp.ne.s32.totalorder %s788_s5, %s627_s9  ;;  %p631_p4 = scmp.lt.u32.totalorder %s627_s9, %s788_s5 }
 0x369   :  { %p633_p5 = pnand %p631_p4, %p628_p3 }
 0x36b   :  { %636 = shalt.err (!%p633_p5)
}
 0x36c   :  { %385 = dma.vmem_to_hbm [thread:$0]  %s380_s30, 256, %s788_s5, [#allocation4], %s650_s3, %s650_s3, %s651_s28  }
 0x36d   :  { %643 = dma.done.wait [#allocation4], 256  }
 0x36e   :  { %644 = vsyncadd [#allocation4], 4294967040 }
 0x36f   :  { %389 = vsyncpa [#allocation3], 1 }
 0x370   :  { %390 = vsyncpa [#allocation6], 1 }
 0x371   :  { %391 = vsyncpa [#allocation9], 1 }
 0x372   :  { %392 = vsyncpa [#allocation4], 1 }

// kernel: tpu_custom_call.1
= control target key start
LH: loop header
LB: loop body
LE: loop exit
PB: predicated region body
PF: predicated region fallthrough
CT: control target
= control target key end

     0   :  { %10 = vsyncpa [#allocation3], 0  ;;  %s783_s0 = inlined_call_operand.hbm [shape: f32[16,128], index: 0, kind: input, shape index: {}]   ;;  %s784_s1 = inlined_call_operand.hbm [shape: bf16[128,128], index: 1, kind: input, shape index: {}]   ;;  %s785_s2 = inlined_call_operand.hbm [shape: f32[1,128], index: 2, kind: input, shape index: {}]   ;;  %s786_s3 = inlined_call_operand.hbm [shape: bf16[128,128], index: 3, kind: input, shape index: {}]   ;;  %s787_s4 = inlined_call_operand.hbm [shape: f32[1,128], index: 4, kind: input, shape index: {}]   ;;  %s788_s5 = inlined_call_operand.hbm [shape: f32[16,128], index: 5, kind: output, shape index: {}]  }
   0x1   :  { %11 = vsyncpa [#allocation6], 0 }
   0x2   :  { %12 = vsyncpa [#allocation9], 0 }
   0x3   :  { %13 = vsyncpa [#allocation4], 0  ;;  %s645_s18 = smov [#allocation5]   ;;  %s505_s22 = scalar_lea.hbm %s784_s1, 1024 }
   0x4   :  { %s31_s19 = sshll.u32 %s645_s18, 4  ;;  %p506_p0 = scmp.ne.s32.totalorder %s784_s1, %s505_s22  ;;  %s32_s19 = int_to_ptr.vmem [resolvable:$true] %s31_s19 }
   0x5   :  { %p509_p1 = scmp.lt.u32.totalorder %s505_s22, %s784_s1 }
   0x7   :  { %p511_p2 = pnand %p509_p1, %p506_p0 }
   0x9   :  { %514 = shalt.err (!%p511_p2)
}
   0xa   :  { %s515_s27 = scalar_lea.vmem %s32_s19, 1024  ;;  %p520_p4 = scmp.lt.s32.totalorder %s32_s19, %s32_s19 }
   0xb   :  { %p516_p3 = scmp.ne.s32.totalorder %s32_s19, %s515_s27  ;;  %p521_p5 = scmp.lt.s32.totalorder %s515_s27, %s515_s27 }
   0xd   :  { %p522_p6 = por %p521_p5, %p520_p4 }
   0xf   :  { %p523_p7 = pnand %p522_p6, %p516_p3 }
  0x11   :  { %526 = shalt.err (!%p523_p7)
}
  0x12   :  { %s646_s28 = smov 64   ;;  %s647_s29 = smov 4  }
  0x13   :  { %37 = dma.hbm_to_vmem [thread:$0]  %s784_s1, 1024, %s32_s19, [#allocation6], %s646_s28, %s646_s28, %s647_s29  }
  0x14   :  { %s648_s7 = smov [#allocation8]   ;;  %s649_s9 = smov [#allocation2]  }
  0x15   :  { %s53_s8 = sshll.u32 %s648_s7, 4  ;;  %s19_s10 = sshll.u32 %s649_s9, 4  ;;  %s54_s8 = int_to_ptr.vmem [resolvable:$true] %s53_s8  ;;  %s20_s10 = int_to_ptr.vmem [resolvable:$true] %s19_s10 }
  0x16   :  { %s527_s13 = scalar_lea.hbm %s786_s3, 1024 }
  0x17   :  { %p528_p8 = scmp.ne.s32.totalorder %s786_s3, %s527_s13  ;;  %p531_p9 = scmp.lt.u32.totalorder %s527_s13, %s786_s3 }
  0x19   :  { %p533_p10 = pnand %p531_p9, %p528_p8 }
  0x1b   :  { %536 = shalt.err (!%p533_p10)
}
  0x1c   :  { %s537_s1 = scalar_lea.vmem %s54_s8, 1024  ;;  %p542_p12 = scmp.lt.s32.totalorder %s54_s8, %s54_s8 }
  0x1d   :  { %p538_p11 = scmp.ne.s32.totalorder %s54_s8, %s537_s1  ;;  %p543_p13 = scmp.lt.s32.totalorder %s537_s1, %s537_s1 }
  0x1f   :  { %p544_p0 = por %p543_p13, %p542_p12 }
  0x21   :  { %p545_p1 = pnand %p544_p0, %p538_p11 }
  0x23   :  { %548 = shalt.err (!%p545_p1)
}
  0x24   :  { %59 = dma.hbm_to_vmem [thread:$0]  %s786_s3, 1024, %s54_s8, [#allocation9], %s646_s28, %s646_s28, %s647_s29  }
  0x25   :  { %s549_s22 = scalar_lea.hbm %s783_s0, 256 }
  0x26   :  { %p550_p2 = scmp.ne.s32.totalorder %s783_s0, %s549_s22  ;;  %p553_p3 = scmp.lt.u32.totalorder %s549_s22, %s783_s0 }
  0x28   :  { %p555_p4 = pnand %p553_p3, %p550_p2 }
  0x2a   :  { %558 = shalt.err (!%p555_p4)
}
  0x2b   :  { %s559_s27 = scalar_lea.vmem %s20_s10, 256  ;;  %p564_p6 = scmp.lt.s32.totalorder %s20_s10, %s20_s10 }
  0x2c   :  { %p560_p5 = scmp.ne.s32.totalorder %s20_s10, %s559_s27  ;;  %p565_p7 = scmp.lt.s32.totalorder %s559_s27, %s559_s27 }
  0x2e   :  { %p566_p8 = por %p565_p7, %p564_p6 }
  0x30   :  { %p567_p9 = pnand %p566_p8, %p560_p5 }
  0x32   :  { %570 = shalt.err (!%p567_p9)
}
  0x33   :  { %s650_s3 = smov 128   ;;  %s651_s28 = smov 8  }
  0x34   :  { %25 = dma.hbm_to_vmem [thread:$0]  %s783_s0, 256, %s20_s10, [#allocation3], %s650_s3, %s650_s3, %s651_s28  }
  0x35   :  { %s652_s6 = smov [#allocation7]   ;;  %s653_s8 = smov [#allocation10]  }
  0x36   :  { %s44_s7 = sshll.u32 %s652_s6, 4  ;;  %s66_s9 = sshll.u32 %s653_s8, 4  ;;  %s45_s7 = int_to_ptr.vmem [resolvable:$true] %s44_s7  ;;  %s67_s9 = int_to_ptr.vmem [resolvable:$true] %s66_s9 }
  0x37   :  { %s571_s13 = scalar_lea.hbm %s785_s2, 16 }
  0x38   :  { %p572_p10 = scmp.ne.s32.totalorder %s785_s2, %s571_s13  ;;  %p575_p11 = scmp.lt.u32.totalorder %s571_s13, %s785_s2 }
  0x3a   :  { %p577_p12 = pnand %p575_p11, %p572_p10 }
  0x3c   :  { %580 = shalt.err (!%p577_p12)
}
  0x3d   :  { %s581_s0 = scalar_lea.vmem %s45_s7, 16  ;;  %s585_s10 = scalar_lea.vmem %s45_s7, 32 }
  0x3e   :  { %p582_p13 = scmp.ne.s32.totalorder %s45_s7, %s581_s0  ;;  %p586_p0 = scmp.lt.s32.totalorder %s45_s7, %s45_s7 }
  0x3f   :  { %p587_p1 = scmp.lt.s32.totalorder %s585_s10, %s581_s0 }
  0x41   :  { %p588_p2 = por %p587_p1, %p586_p0 }
  0x43   :  { %p589_p3 = pnand %p588_p2, %p582_p13 }
  0x45   :  { %592 = shalt.err (!%p589_p3)
}
  0x46   :  { %47 = dma.hbm_to_vmem [thread:$0]  %s785_s2, 16, %s45_s7, [#allocation6]  }
  0x47   :  { %s593_s21 = scalar_lea.hbm %s787_s4, 16 }
  0x48   :  { %p594_p4 = scmp.ne.s32.totalorder %s787_s4, %s593_s21  ;;  %p597_p5 = scmp.lt.u32.totalorder %s593_s21, %s787_s4 }
  0x4a   :  { %p599_p6 = pnand %p597_p5, %p594_p4 }
  0x4c   :  { %602 = shalt.err (!%p599_p6)
}
  0x4d   :  { %s603_s26 = scalar_lea.vmem %s67_s9, 16  ;;  %s607_s27 = scalar_lea.vmem %s67_s9, 32 }
  0x4e   :  { %p604_p7 = scmp.ne.s32.totalorder %s67_s9, %s603_s26  ;;  %p608_p8 = scmp.lt.s32.totalorder %s67_s9, %s67_s9 }
  0x4f   :  { %p609_p9 = scmp.lt.s32.totalorder %s607_s27, %s603_s26 }
  0x51   :  { %p610_p10 = por %p609_p9, %p608_p8 }
  0x53   :  { %p611_p11 = pnand %p610_p10, %p604_p7 }
  0x55   :  { %614 = shalt.err (!%p611_p11)
}
  0x56   :  { %69 = dma.hbm_to_vmem [thread:$0]  %s787_s4, 16, %s67_s9, [#allocation9]  }
  0x57   :  { %637 = dma.done.wait [#allocation3], 256  }
  0x58   :  { %638 = vsyncadd [#allocation3], 4294967040 }
  0x59   :  { %639 = dma.done.wait [#allocation6], 1040  }
  0x5a   :  { %640 = vsyncadd [#allocation6], 4294966256 }
  0x5b   :  { %641 = dma.done.wait [#allocation9], 1040  }
  0x5c   :  { %642 = vsyncadd [#allocation9], 4294966256  ;;  %v654_v0 = vmov 0.0   ;;  %v86_v1 = vld [vmem:[#allocation2] sm:$0xff]  ;;  %v87_v2 = vld [vmem:[#allocation2 + $0x8] sm:$0xff]  ;;  %vm655_vm0 = vmmov 0  }
  0x5d   :  { %429 = vmatprep.subr.bf16.mxu0 %v654_v0  ;;  %449 = vmatprep.subr.bf16.mxu1 %v654_v0  ;;  %v94_v3 = vmul.f32 %v86_v1, %v86_v1  ;;  %v481_v4 = vld [vmem:[#allocation5] sm:$0xff]   ;;  %v95_v5 = vmul.f32 %v87_v2, %v87_v2  ;;  %v482_v6 = vld [vmem:[#allocation5 + $0x8] sm:$0xff]   ;;  %v483_v7 = vld [vmem:[#allocation5 + $0x10] sm:$0xff]   ;;  %s656_s4 = smov [#allocation11]  }
  0x5e   :  { %88 = vadd.xlane.f32.xlu0 %v86_v1  ;;  %430 = vmatpush3.bf16.msra.mxu0 %v481_v4  ;;  %v484_v8 = vld [vmem:[#allocation5 + $0x18] sm:$0xff]   ;;  %v485_v9 = vld [vmem:[#allocation5 + $0x20] sm:$0xff]   ;;  %v486_v10 = vld [vmem:[#allocation5 + $0x28] sm:$0xff]   ;;  %s379_s30 = sshll.u32 %s656_s4, 4  ;;  %s380_s30 = int_to_ptr.vmem [resolvable:$true] %s379_s30 }
  0x5f   :  { %96 = vadd.xlane.f32.xlu1 %v94_v3  ;;  %431 = vmatprep.subr.bf16.mxu0 %v654_v0  ;;  %v487_v11 = vld [vmem:[#allocation5 + $0x30] sm:$0xff]   ;;  %v488_v12 = vld [vmem:[#allocation5 + $0x38] sm:$0xff]   ;;  %v489_v36 = vld [vmem:[#allocation8] sm:$0xff]   ;;  %s615_s6 = scalar_lea.vmem %s380_s30, 256  ;;  %p620_p13 = scmp.lt.s32.totalorder %s380_s30, %s380_s30 }
  0x60   :  { %445 = vmatprep.mubr.msk.bf16.mxu0 %vm655_vm0, %v654_v0  ;;  %465 = vmatprep.mubr.msk.bf16.mxu1 %vm655_vm0, %v654_v0  ;;  %v393_v37 = vld [vmem:[#allocation7] ss:$0 sm:$0xff]  ;;  %v490_v48 = vld [vmem:[#allocation8 + $0x8] sm:$0xff]   ;;  %v491_v49 = vld [vmem:[#allocation8 + $0x10] sm:$0xff]   ;;  %p616_p12 = scmp.ne.s32.totalorder %s380_s30, %s615_s6  ;;  %p621_p0 = scmp.lt.s32.totalorder %s615_s6, %s615_s6 }
  0x61   :  { %450 = vmatpush3.bf16.msra.mxu1 %v489_v36  ;;  %v492_v50 = vld [vmem:[#allocation8 + $0x18] sm:$0xff]   ;;  %v493_v51 = vld [vmem:[#allocation8 + $0x20] sm:$0xff]   ;;  %v494_v52 = vld [vmem:[#allocation8 + $0x28] sm:$0xff]  }
  0x62   :  { %90 = vadd.xlane.f32.xlu0 %v87_v2  ;;  %432 = vmatpush3.bf16.msra.mxu0 %v482_v6  ;;  %v495_v53 = vld [vmem:[#allocation8 + $0x30] sm:$0xff]   ;;  %v496_v54 = vld [vmem:[#allocation8 + $0x38] sm:$0xff]   ;;  %p622_p1 = por %p621_p0, %p620_p13 }
  0x63   :  { %98 = vadd.xlane.f32.xlu1 %v95_v5  ;;  %433 = vmatprep.subr.bf16.mxu0 %v654_v0 }
  0x64   :  { %451 = vmatprep.subr.bf16.mxu1 %v654_v0  ;;  %p623_p2 = pnand %p622_p1, %p616_p12 }
  0x65   :  { %452 = vmatpush3.bf16.msra.mxu1 %v490_v48 }
  0x66   :  { %434 = vmatpush3.bf16.msra.mxu0 %v483_v7  ;;  %453 = vmatprep.subr.bf16.mxu1 %v654_v0 }
  0x67   :  { %435 = vmatprep.subr.bf16.mxu0 %v654_v0 }
  0x69   :  { %454 = vmatpush3.bf16.msra.mxu1 %v491_v49 }
  0x6a   :  { %436 = vmatpush3.bf16.msra.mxu0 %v484_v8  ;;  %455 = vmatprep.subr.bf16.mxu1 %v654_v0 }
  0x6b   :  { %437 = vmatprep.subr.bf16.mxu0 %v654_v0 }
  0x6d   :  { %456 = vmatpush3.bf16.msra.mxu1 %v492_v50 }
  0x6e   :  { %438 = vmatpush3.bf16.msra.mxu0 %v485_v9  ;;  %457 = vmatprep.subr.bf16.mxu1 %v654_v0 }
  0x6f   :  { %439 = vmatprep.subr.bf16.mxu0 %v654_v0 }
  0x71   :  { %458 = vmatpush3.bf16.msra.mxu1 %v493_v51 }
  0x72   :  { %440 = vmatpush3.bf16.msra.mxu0 %v486_v10  ;;  %459 = vmatprep.subr.bf16.mxu1 %v654_v0 }
  0x73   :  { %441 = vmatprep.subr.bf16.mxu0 %v654_v0 }
  0x75   :  { %460 = vmatpush3.bf16.msra.mxu1 %v494_v52 }
  0x76   :  { %442 = vmatpush3.bf16.msra.mxu0 %v487_v11  ;;  %461 = vmatprep.subr.bf16.mxu1 %v654_v0 }
  0x77   :  { %443 = vmatprep.subr.bf16.mxu0 %v654_v0 }
  0x79   :  { %462 = vmatpush3.bf16.msra.mxu1 %v495_v53 }
  0x7a   :  { %444 = vmatpush3.bf16.msra.mxu0 %v488_v12  ;;  %463 = vmatprep.subr.bf16.mxu1 %v654_v0 }
  0x7d   :  { %464 = vmatpush3.bf16.msra.mxu1 %v496_v54 }
  0xeb   :  { %v89_v13 = vpop.xlane.xlu0 %88 }
  0xec   :  { %v92_v14 = vmul.f32 0.03125, %v89_v13  ;;  %v97_v15 = vpop.xlane.xlu1 %96 }
  0xed   :  { %v100_v17 = vmul.f32 0.03125, %v97_v15 }
  0xee   :  { %v102_v16 = vmul.f32 %v92_v14, %v92_v14  ;;  %v108_v30 = vsub.f32 %v86_v1, %v92_v14  ;;  %v402_v14 = vld [vmem:[#allocation10] ss:$0 sm:$0xff] }
  0xef   :  { %v91_v18 = vpop.xlane.xlu0 %90 }
  0xf0   :  { %v104_v19 = vsub.f32 %v100_v17, %v102_v16  ;;  %v93_v20 = vmul.f32 0.03125, %v91_v18  ;;  %v99_v21 = vpop.xlane.xlu1 %98 }
  0xf1   :  { %v101_v24 = vmul.f32 0.03125, %v99_v21 }
  0xf2   :  { %v106_v22 = vmax.f32 %v104_v19, 0.0  ;;  %v103_v23 = vmul.f32 %v93_v20, %v93_v20  ;;  %v109_v31 = vsub.f32 %v87_v2, %v93_v20 }
  0xf4   :  { %v110_v25 = vadd.f32 1e-05, %v106_v22  ;;  %v105_v26 = vsub.f32 %v101_v24, %v103_v23 }
  0xf6   :  { %v107_v27 = vmax.f32 %v105_v26, 0.0  ;;  %497 = vrsqrt.f32 %v110_v25 }
  0xf8   :  { %v111_v28 = vadd.f32 1e-05, %v107_v27 }
  0xfa   :  { %499 = vrsqrt.f32 %v111_v28 }
 0x100   :  { %v498_v29 = vpop.eup %497 }
 0x101   :  { %v114_v33 = vmul.f32 %v498_v29, %v108_v30 }
 0x104   :  { %v500_v32 = vpop.eup %499 }
 0x105   :  { %v115_v34 = vmul.f32 %v500_v32, %v109_v31 }
 0x107   :  { %v116_v35 = vpack.c.bf16 %v115_v34, %v114_v33 }
 0x109   :  { %446 = vmatmul.mubr.bf16.vlgmr.msra.gmra.mrb[0].mxu0 %v116_v35 }
 0x1dc   :  { %v222_v38 = vpop.f32.mrb[0].mxu0 }
 0x1dd   :  { %v223_v39 = vadd.f32 %v393_v37, %v222_v38  ;;  %v447_v40 = vpop.f32.mrb[1].mxu0 }
 0x1de   :  { %v225_v41 = vpop.f32.mrb[2].mxu0 }
 0x1df   :  { %v229_v42 = vmax.f32 %v223_v39, 0.0  ;;  %v226_v43 = vadd.f32 %v393_v37, %v225_v41  ;;  %v448_v44 = vpop.f32.mrb[3].mxu0 }
 0x1e1   :  { %v230_v45 = vmax.f32 %v226_v43, 0.0  ;;  %231 = vadd.xlane.f32.xlu0 %v229_v42  ;;  %v237_v46 = vmul.f32 %v229_v42, %v229_v42 }
 0x1e3   :  { %233 = vadd.xlane.f32.xlu1 %v230_v45  ;;  %v238_v47 = vmul.f32 %v230_v45, %v230_v45 }
 0x1e5   :  { %239 = vadd.xlane.f32.xlu0 %v237_v46 }
 0x1e7   :  { %241 = vadd.xlane.f32.xlu1 %v238_v47 }
 0x26e   :  { %v232_v55 = vpop.xlane.xlu0 %231 }
 0x26f   :  { %v235_v56 = vmul.f32 0.015625, %v232_v55 }
 0x270   :  { %v234_v57 = vpop.xlane.xlu1 %233 }
 0x271   :  { %v236_v58 = vmul.f32 0.015625, %v234_v57  ;;  %v245_v60 = vmul.f32 %v235_v56, %v235_v56  ;;  %v251_v8 = vsub.f32 %v229_v42, %v235_v56 }
 0x272   :  { %v240_v59 = vpop.xlane.xlu0 %239 }
 0x273   :  { %v243_v61 = vmul.f32 0.015625, %v240_v59  ;;  %v246_v63 = vmul.f32 %v236_v58, %v236_v58  ;;  %v252_v9 = vsub.f32 %v230_v45, %v236_v58 }
 0x274   :  { %v242_v62 = vpop.xlane.xlu1 %241 }
 0x275   :  { %v247_v1 = vsub.f32 %v243_v61, %v245_v60  ;;  %v244_v2 = vmul.f32 0.015625, %v242_v62 }
 0x277   :  { %v249_v3 = vmax.f32 %v247_v1, 0.0  ;;  %v248_v4 = vsub.f32 %v244_v2, %v246_v63 }
 0x279   :  { %v253_v5 = vadd.f32 1e-05, %v249_v3  ;;  %v250_v6 = vmax.f32 %v248_v4, 0.0 }
 0x27b   :  { %501 = vrsqrt.f32 %v253_v5  ;;  %v254_v7 = vadd.f32 1e-05, %v250_v6 }
 0x27d   :  { %503 = vrsqrt.f32 %v254_v7 }
 0x285   :  { %v502_v0 = vpop.eup %501 }
 0x286   :  { %v257_v11 = vmul.f32 %v502_v0, %v251_v8 }
 0x287   :  { %v504_v10 = vpop.eup %503 }
 0x288   :  { %v258_v12 = vmul.f32 %v504_v10, %v252_v9 }
 0x28a   :  { %v259_v13 = vpack.c.bf16 %v258_v12, %v257_v11 }
 0x28c   :  { %466 = vmatmul.mubr.bf16.vlgmr.msra.gmra.mrb[0].mxu1 %v259_v13 }
 0x35f   :  { %v365_v15 = vpop.f32.mrb[0].mxu1 }
 0x360   :  { %v366_v16 = vadd.f32 %v402_v14, %v365_v15  ;;  %v467_v17 = vpop.f32.mrb[1].mxu1 }
 0x361   :  { %v368_v18 = vpop.f32.mrb[2].mxu1 }
 0x362   :  { %372 = vst [vmem:[#allocation11] sm:$0xff] %v366_v16  ;;  %v369_v19 = vadd.f32 %v402_v14, %v368_v18  ;;  %v468_v20 = vpop.f32.mrb[3].mxu1 }
 0x364   :  { %373 = vst [vmem:[#allocation11 + $0x8] sm:$0xff] %v369_v19 }
 0x365   :  { %626 = shalt.err (!%p623_p2)
}
 0x366   :  { %s627_s9 = scalar_lea.hbm %s788_s5, 256 }
 0x367   :  { %p628_p3 = scmp.ne.s32.totalorder %s788_s5, %s627_s9  ;;  %p631_p4 = scmp.lt.u32.totalorder %s627_s9, %s788_s5 }
 0x369   :  { %p633_p5 = pnand %p631_p4, %p628_p3 }
 0x36b   :  { %636 = shalt.err (!%p633_p5)
}
 0x36c   :  { %385 = dma.vmem_to_hbm [thread:$0]  %s380_s30, 256, %s788_s5, [#allocation4], %s650_s3, %s650_s3, %s651_s28  }
 0x36d   :  { %643 = dma.done.wait [#allocation4], 256  }
 0x36e   :  { %644 = vsyncadd [#allocation4], 4294967040 }
 0x36f   :  { %389 = vsyncpa [#allocation3], 1 }
 0x370   :  { %390 = vsyncpa [#allocation6], 1 }
 0x371   :  { %391 = vsyncpa [#allocation9], 1 }
 0x372   :  { %392 = vsyncpa [#allocation4], 1 }

</bundles_post_ra>
